<compile_context>
chip_gen: v7x
topology: tpu7x:2x2x1
jax: 0.10.0
libtpu: 0.0.40
codegen_flags: <defaults>
</compile_context>

<pallas_src>
import functools

import jax
import jax.numpy as jnp
from jax.experimental import pallas as pl
from jax.experimental.pallas import tpu as pltpu

_EPS = 1e-5
_LANE = 128
_SUB = 8


def _round_up(x, m):
    return (x + m - 1) // m * m


def block_paddings(kernel_size, stack_num, stack_size):
    """Per-block left padding = dilation * (kernel_size - 1), in MDTC block order."""
    pads = [kernel_size - 1]                                   # preprocessor, dilation 1
    for _ in range(stack_num):
        for j in range(stack_size):
            pads.append((kernel_size - 1) * (2 ** j))
    return pads


def block_layout(in_channels, res_channels, kernel_size, stack_num, stack_size):
    """Per-block (c_in, dilation, residual_flag, stack_end_flag)."""
    layout = [(in_channels, 1, int(in_channels == res_channels), 0)]
    for _ in range(stack_num):
        for j in range(stack_size):
            layout.append((res_channels, 2 ** j, 1, int(j == stack_size - 1)))
    return layout


# ---------------------------------------------------------------------------
# Fused MDTC kernel: one grid step = one TCNBlock applied to one batch row.
#   depthwise dilated conv -> 1x1 conv -> ReLU -> 1x1 conv -> (+residual) -> ReLU
# (BatchNorm layers are pre-folded into the weights / packed biases.)
# ---------------------------------------------------------------------------
def _mdtc_fused_kernel(meta_ref,                      # SMEM (L,3): [dilation, res, stack_end]
                       x_ref, w_dw_ref, w_pw_ref, w2_ref, bias_ref,
                       o_ref, cache_ref,
                       xpad_ref,                      # VMEM (hoff+T, Cp), persists over l
                       *, seq_len, hoff, kernel_size, compute_dtype):
    l = pl.program_id(1)
    cp = xpad_ref.shape[1]

    # First block of this batch row: zero the (max) left-context head once, place the
    # input at the 8-aligned offset `hoff`, and clear the stack-sum output accumulator.
    @pl.when(l == 0)
    def _init():
        xpad_ref[0:hoff, :] = jnp.zeros((hoff, cp), jnp.float32)
        xpad_ref[pl.ds(hoff, seq_len), :] = x_ref[...]
        o_ref[...] = jnp.zeros_like(o_ref)

    dil = meta_ref[l, 0]
    res_flag = meta_ref[l, 1]
    stack_end = meta_ref[l, 2]

    # Current block input (output of the previous block).  Read once: reused as the last
    # depthwise tap, the residual term and the streaming-cache source.
    h_in = xpad_ref[pl.ds(hoff, seq_len), :]                 # (T, Cp) f32
    cache_ref[...] = h_in[seq_len - hoff:, :]                # last hoff frames of input

    # Depthwise dilated conv (BN0 scale folded into w_dw; its bias folded into bias[0]).
    acc = h_in * w_dw_ref[kernel_size - 1, :]                # tap K-1 starts exactly at hoff
    for k in range(kernel_size - 1):                         # small static unrolled tap loop
        start = hoff - dil * (kernel_size - 1 - k)
        acc = acc + xpad_ref[pl.ds(start, seq_len), :] * w_dw_ref[k, :]

    # Pointwise (1x1) convs as lane-dense (T,Cp)x(Cp,Cp) MXU matmuls, weights pre-cast to
    # compute_dtype (bf16 by default), f32 accumulation.
    y = jnp.dot(acc.astype(compute_dtype), w_pw_ref[...],
                preferred_element_type=jnp.float32) + bias_ref[0, :]
    y = jnp.maximum(y, 0.0)                                  # relu1 (bn1 folded)
    z = jnp.dot(y.astype(compute_dtype), w2_ref[...],
                preferred_element_type=jnp.float32) + bias_ref[1, :]
    z = jnp.where(res_flag == 1, z + h_in, z)                # residual iff c_in == c_res
    h_out = jnp.maximum(z, 0.0)                              # relu2

    # Input to the next block (stays in VMEM, never round-trips HBM).
    xpad_ref[pl.ds(hoff, seq_len), :] = h_out

    # Multi-scale sum: accumulate the output of the last block of each stack.
    @pl.when(stack_end == 1)
    def _acc():
        o_ref[...] = o_ref[...] + h_out


def mdtc_forward(x, params, *, in_channels, res_channels, kernel_size,
                 stack_num, stack_size, compute_dtype=jnp.bfloat16):
    """x: (B, T, in_channels) channels-last. Returns (out (B,T,res), cache (B,total_pad,C))."""
    B, T, C = x.shape
    assert C == in_channels, (C, in_channels)
    L = 1 + stack_num * stack_size
    K = kernel_size
    Cp = params["w_pw"].shape[-1]
    assert params["w_dw"].shape == (L, K, Cp), params["w_dw"].shape

    pads = block_paddings(kernel_size, stack_num, stack_size)
    hoff = max(_SUB, _round_up(max(pads), _SUB))             # 8-aligned activation offset
    # TODO(synk): T < receptive padding (very short streaming chunks) not supported here.
    assert T >= hoff, (T, hoff)

    xp = jnp.pad(x, ((0, 0), (0, 0), (0, Cp - in_channels)))  # lane-pad channels once

    # VMEM budget (per core): resident scratch + resident out block + double-buffered
    # x / cache / per-block weights + temporaries.  Must fit v7x's 64 MiB.
    wbytes = jnp.dtype(compute_dtype).itemsize
    vmem_need = ((hoff + T) * Cp * 4 + T * Cp * 4 + 2 * T * Cp * 4 + 2 * hoff * Cp * 4
                 + 2 * (K * Cp * 4 + 2 * Cp * Cp * wbytes + 2 * Cp * 4)
                 + 6 * T * Cp * 4)
    assert vmem_need < (60 << 20), ("sequence too long for whole-T-resident kernel",
                                    vmem_need)
    vmem_limit = int(min(max(vmem_need + (2 << 20), 32 << 20), 60 << 20))

    kernel = functools.partial(_mdtc_fused_kernel, seq_len=T, hoff=hoff,
                               kernel_size=K, compute_dtype=compute_dtype)

    grid_spec = pltpu.PrefetchScalarGridSpec(
        num_scalar_prefetch=1,                               # meta table -> SMEM
        grid=(B, L),                                         # b parallel, l sequential
        in_specs=[
            pl.BlockSpec((None, T, Cp), lambda b, l, m: (b, 0, 0)),      # x (resident per b)
            pl.BlockSpec((None, K, Cp), lambda b, l, m: (l, 0, 0)),      # w_dw
            pl.BlockSpec((None, Cp, Cp), lambda b, l, m: (l, 0, 0)),     # w_pw
            pl.BlockSpec((None, Cp, Cp), lambda b, l, m: (l, 0, 0)),     # w2
            pl.BlockSpec((None, 2, Cp), lambda b, l, m: (l, 0, 0)),      # packed biases
        ],
        out_specs=[
            pl.BlockSpec((None, T, Cp), lambda b, l, m: (b, 0, 0)),      # stack-sum (acc over l)
            pl.BlockSpec((None, None, hoff, Cp), lambda b, l, m: (l, b, 0, 0)),  # caches
        ],
        scratch_shapes=[pltpu.VMEM((hoff + T, Cp), jnp.float32)],
    )

    out_p, caches_p = pl.pallas_call(
        kernel,
        grid_spec=grid_spec,
        out_shape=(jax.ShapeDtypeStruct((B, T, Cp), jnp.float32),
                   jax.ShapeDtypeStruct((L, B, hoff, Cp), jnp.float32)),
        compiler_params=pltpu.CompilerParams(
            dimension_semantics=("parallel", "arbitrary"),
            vmem_limit_bytes=vmem_limit),
    )(params["meta"], xp, params["w_dw"], params["w_pw"], params["w2"], params["bias"])

    out = out_p[:, :, :res_channels]
    # Per-block cache = last pad_i frames of that block's input (channels-last), concat
    # along the padding/time axis like the torch module (requires in == res to concat).
    cache_parts = []
    for i, p in enumerate(pads):
        c_i = in_channels if i == 0 else res_channels
        cache_parts.append(caches_p[i, :, hoff - p:, :c_i])
    new_cache = jnp.concatenate(cache_parts, axis=1)
    return out, new_cache


# ---------------------------------------------------------------------------
# Parameter construction: raw (torch-like) params + folded / padded / stacked params.
# ---------------------------------------------------------------------------
def _init_bn(key, c):
    kg, kb, km, kv = jax.random.split(key, 4)
    return dict(gamma=1.0 + 0.1 * jax.random.normal(kg, (c,), jnp.float32),
                beta=0.1 * jax.random.normal(kb, (c,), jnp.float32),
                mean=0.1 * jax.random.normal(km, (c,), jnp.float32),
                var=1.0 + 0.5 * jax.random.uniform(kv, (c,), jnp.float32))


def init_block_raw(key, c_in, c_res, kernel_size):
    ks = jax.random.split(key, 9)
    return dict(
        w_dw=0.1 * jax.random.normal(ks[0], (kernel_size, c_in), jnp.float32),
        b_dw=0.1 * jax.random.normal(ks[1], (c_in,), jnp.float32),
        bn0=_init_bn(ks[2], c_in),
        w_pw=0.1 * jax.random.normal(ks[3], (c_in, c_res), jnp.float32),
        b_pw=0.1 * jax.random.normal(ks[4], (c_res,), jnp.float32),
        bn1=_init_bn(ks[5], c_res),
        w2=0.1 * jax.random.normal(ks[6], (c_res, c_res), jnp.float32),
        b2=0.1 * jax.random.normal(ks[7], (c_res,), jnp.float32),
        bn2=_init_bn(ks[8], c_res))


def init_mdtc_raw(key, in_channels, res_channels, kernel_size, stack_num, stack_size):
    L = 1 + stack_num * stack_size
    keys = jax.random.split(key, L)
    blocks = [init_block_raw(keys[0], in_channels, res_channels, kernel_size)]
    for i in range(1, L):
        blocks.append(init_block_raw(keys[i], res_channels, res_channels, kernel_size))
    return blocks


def _bn_scale_shift(bn):
    s = bn["gamma"] / jnp.sqrt(bn["var"] + _EPS)
    return s, bn["beta"] - bn["mean"] * s


def _fold_block(raw, c_in, c_res, cp, matmul_dtype):
    """Fold inference-mode BN into conv weights/biases; zero-pad channels to cp lanes."""
    s0, t0 = _bn_scale_shift(raw["bn0"])
    s1, t1 = _bn_scale_shift(raw["bn1"])
    s2, t2 = _bn_scale_shift(raw["bn2"])
    w_dw = raw["w_dw"] * s0                                  # (K, c_in)
    b0 = raw["b_dw"] * s0 + t0                               # per-channel constant
    w_pw = raw["w_pw"] * s1                                  # (c_in, c_res)
    b1 = b0 @ w_pw + raw["b_pw"] * s1 + t1                   # dw bias folded through 1x1
    w2 = raw["w2"] * s2
    b2 = raw["b2"] * s2 + t2
    K = w_dw.shape[0]
    w_dw_p = jnp.zeros((K, cp), jnp.float32).at[:, :c_in].set(w_dw)
    w_pw_p = jnp.zeros((cp, cp), jnp.float32).at[:c_in, :c_res].set(w_pw).astype(matmul_dtype)
    w2_p = jnp.zeros((cp, cp), jnp.float32).at[:c_res, :c_res].set(w2).astype(matmul_dtype)
    bias_p = (jnp.zeros((2, cp), jnp.float32)
              .at[0, :c_res].set(b1).at[1, :c_res].set(b2))
    return w_dw_p, w_pw_p, w2_p, bias_p


def fold_mdtc_params(raw_blocks, in_channels, res_channels, kernel_size,
                     stack_num, stack_size, matmul_dtype=jnp.bfloat16):
    cp = _round_up(max(in_channels, res_channels), _LANE)
    layout = block_layout(in_channels, res_channels, kernel_size, stack_num, stack_size)
    assert len(layout) == len(raw_blocks)
    wdw, wpw, w2s, biases, meta = [], [], [], [], []
    for raw, (c_in, dil, resf, send) in zip(raw_blocks, layout):
        a, b_, c, d = _fold_block(raw, c_in, res_channels, cp, matmul_dtype)
        wdw.append(a); wpw.append(b_); w2s.append(c); biases.append(d)
        meta.append([dil, resf, send])
    return dict(w_dw=jnp.stack(wdw), w_pw=jnp.stack(wpw), w2=jnp.stack(w2s),
                bias=jnp.stack(biases), meta=jnp.asarray(meta, jnp.int32))


# ---------------------------------------------------------------------------
# Pure-JAX reference (inference-mode BN, unfolded, f32) for correctness checking.
# ---------------------------------------------------------------------------
def _ref_bn(x, bn):
    return (x - bn["mean"]) / jnp.sqrt(bn["var"] + _EPS) * bn["gamma"] + bn["beta"]


def ref_tcn_block(x, raw, kernel_size, dilation):
    B, T, c_in = x.shape
    pad = dilation * (kernel_size - 1)
    xpad = jnp.pad(x, ((0, 0), (pad, 0), (0, 0)))
    new_cache = xpad[:, xpad.shape[1] - pad:, :]
    dw = sum(xpad[:, k * dilation:k * dilation + T, :] * raw["w_dw"][k]
             for k in range(kernel_size)) + raw["b_dw"]
    dw = _ref_bn(dw, raw["bn0"])
    y = dw @ raw["w_pw"] + raw["b_pw"]
    y = jnp.maximum(_ref_bn(y, raw["bn1"]), 0.0)
    z = _ref_bn(y @ raw["w2"] + raw["b2"], raw["bn2"])
    if c_in == raw["w_pw"].shape[1]:
        z = z + x
    return jnp.maximum(z, 0.0), new_cache


def ref_mdtc(x, raw_blocks, kernel_size, stack_num, stack_size):
    caches = []
    h, c = ref_tcn_block(x, raw_blocks[0], kernel_size, 1)
    caches.append(c)
    outs = []
    i = 1
    for _ in range(stack_num):
        for j in range(stack_size):
            h, c = ref_tcn_block(h, raw_blocks[i], kernel_size, 2 ** j)
            caches.append(c)
            i += 1
        outs.append(h)
    return sum(outs), jnp.concatenate(caches, axis=1)


if __name__ == "__main__":
    B, T = 2, 16
    in_channels = res_channels = 32      # equal -> residual path active, caches concat
    kernel_size = 5                      # MDTC requires an odd kernel size
    stack_num, stack_size = 2, 2         # dilations per stack: [1, 2]

    key = jax.random.PRNGKey(0)
    kx, kp = jax.random.split(key)
    x = jax.random.normal(kx, (B, T, in_channels), jnp.float32)
    raw_blocks = init_mdtc_raw(kp, in_channels, res_channels, kernel_size,
                               stack_num, stack_size)

    fold = functools.partial(fold_mdtc_params, raw_blocks, in_channels, res_channels,
                             kernel_size, stack_num, stack_size)
    params_f32 = fold(matmul_dtype=jnp.float32)
    params_bf16 = fold(matmul_dtype=jnp.bfloat16)

    fwd = functools.partial(mdtc_forward, in_channels=in_channels,
                            res_channels=res_channels, kernel_size=kernel_size,
                            stack_num=stack_num, stack_size=stack_size)
    out_f32, cache_f32 = jax.jit(functools.partial(fwd, compute_dtype=jnp.float32))(
        x, params_f32)
    out_bf16, cache_bf16 = jax.jit(functools.partial(fwd, compute_dtype=jnp.bfloat16))(
        x, params_bf16)
    jax.block_until_ready((out_f32, cache_f32, out_bf16, cache_bf16))

    ref_out, ref_cache = ref_mdtc(x, raw_blocks, kernel_size, stack_num, stack_size)

    total_pad = (kernel_size - 1) * (1 + stack_num * sum(2 ** l for l in range(stack_size)))
    assert out_f32.shape == (B, T, res_channels)
    assert cache_f32.shape == (B, total_pad, in_channels)
    # f32 matmul path: only BN-folding reordering + MXU rounding -> tight tolerance.
    assert jnp.allclose(out_f32, ref_out, atol=5e-3, rtol=5e-3), \
        float(jnp.max(jnp.abs(out_f32 - ref_out)))
    assert jnp.allclose(cache_f32, ref_cache, atol=5e-3, rtol=5e-3), \
        float(jnp.max(jnp.abs(cache_f32 - ref_cache)))
    # bf16 perf path (default): rounding compounds across 5 chained blocks; check against
    # the f32 reference at 8% of its dynamic range.
    rel = float(jnp.max(jnp.abs(out_bf16 - ref_out)) /
                (jnp.max(jnp.abs(ref_out)) + 1e-6))
    assert rel < 0.08, rel
    assert cache_bf16.shape == cache_f32.shape

    print("KERNEL_OK")
</pallas_src>

<mosaic_0001>
module attributes {stable_mosaic.version = 11 : i64} {
  func.func @_mdtc_fused_kernel(%arg0: i32, %arg1: i32, %arg2: memref<5x3xi32, #tpu.memory_space<smem>>, %arg3: memref<1x16x128xf32, #tpu.memory_space<vmem>>, %arg4: memref<1x5x128xf32, #tpu.memory_space<vmem>>, %arg5: memref<1x128x128xf32, #tpu.memory_space<vmem>>, %arg6: memref<1x128x128xf32, #tpu.memory_space<vmem>>, %arg7: memref<1x2x128xf32, #tpu.memory_space<vmem>>, %arg8: memref<1x16x128xf32, #tpu.memory_space<vmem>>, %arg9: memref<1x1x8x128xf32, #tpu.memory_space<vmem>>, %arg10: memref<24x128xf32, #tpu.memory_space<vmem>>) attributes {dimension_semantics = [#tpu.dimension_semantics<parallel>, #tpu.dimension_semantics<arbitrary>], iteration_bounds = array<i64: 2, 5>, scalar_prefetch = 1 : i64, scratch_operands = 1 : i64, tpu.core_type = #tpu.core_type<tc>, window_params = [{transform_indices = @transform_0, window_bounds = array<i64: 1, 16, 128>}, {transform_indices = @transform_1, window_bounds = array<i64: 1, 5, 128>}, {transform_indices = @transform_2, window_bounds = array<i64: 1, 128, 128>}, {transform_indices = @transform_3, window_bounds = array<i64: 1, 128, 128>}, {transform_indices = @transform_4, window_bounds = array<i64: 1, 2, 128>}, {transform_indices = @transform_5, window_bounds = array<i64: 1, 16, 128>}, {transform_indices = @transform_6, window_bounds = array<i64: 1, 1, 8, 128>}]} {
    %c0_i32 = arith.constant 0 : i32
    %0 = arith.cmpi eq, %arg1, %c0_i32 : i32
    %1 = arith.extui %0 : i1 to i32
    %c0_i32_0 = arith.constant 0 : i32
    %2 = arith.cmpi ne, %1, %c0_i32_0 : i32
    scf.if %2 {
      %cst_46 = arith.constant 0.000000e+00 : f32
      %86 = vector.broadcast %cst_46 : f32 to vector<8x128xf32>
      %c0_47 = arith.constant 0 : index
      %c0_48 = arith.constant 0 : index
      %87 = vector.load %arg10[%c0_47, %c0_48] : memref<24x128xf32, #tpu.memory_space<vmem>>, vector<8x128xf32>
      tpu.vector_store %arg10[%c0_47, %c0_48], %86 {strides = array<i32>} : memref<24x128xf32, #tpu.memory_space<vmem>>, vector<8x128xf32>,
      %c0_49 = arith.constant 0 : index
      %c0_50 = arith.constant 0 : index
      %c0_51 = arith.constant 0 : index
      %88 = vector.load %arg3[%c0_49, %c0_50, %c0_51] : memref<1x16x128xf32, #tpu.memory_space<vmem>>, vector<1x16x128xf32>
      %89 = vector.shape_cast %88 : vector<1x16x128xf32> to vector<16x128xf32>
      %c8_52 = arith.constant 8 : index
      %c0_53 = arith.constant 0 : index
      %90 = vector.load %arg10[%c8_52, %c0_53] : memref<24x128xf32, #tpu.memory_space<vmem>>, vector<16x128xf32>
      tpu.vector_store %arg10[%c8_52, %c0_53], %89 {strides = array<i32>} : memref<24x128xf32, #tpu.memory_space<vmem>>, vector<16x128xf32>,
      %cst_54 = arith.constant 0.000000e+00 : f32
      %91 = vector.broadcast %cst_54 : f32 to vector<16x128xf32>
      %c0_55 = arith.constant 0 : index
      %c0_56 = arith.constant 0 : index
      %c0_57 = arith.constant 0 : index
      %92 = vector.load %arg8[%c0_55, %c0_56, %c0_57] : memref<1x16x128xf32, #tpu.memory_space<vmem>>, vector<1x16x128xf32>
      %93 = vector.shape_cast %92 : vector<1x16x128xf32> to vector<16x128xf32>
      %94 = vector.shape_cast %91 : vector<16x128xf32> to vector<1x16x128xf32>
      tpu.vector_store %arg8[%c0_55, %c0_56, %c0_57], %94 {strides = array<i32>} : memref<1x16x128xf32, #tpu.memory_space<vmem>>, vector<1x16x128xf32>,
    } else {
    }
    %3 = arith.index_cast %arg1 : i32 to index
    %c0 = arith.constant 0 : index
    %4 = memref.load %arg2[%3, %c0] : memref<5x3xi32, #tpu.memory_space<smem>>
    %5 = arith.index_cast %arg1 : i32 to index
    %c1 = arith.constant 1 : index
    %6 = memref.load %arg2[%5, %c1] : memref<5x3xi32, #tpu.memory_space<smem>>
    %7 = arith.index_cast %arg1 : i32 to index
    %c2 = arith.constant 2 : index
    %8 = memref.load %arg2[%7, %c2] : memref<5x3xi32, #tpu.memory_space<smem>>
    %c8 = arith.constant 8 : index
    %c0_1 = arith.constant 0 : index
    %9 = vector.load %arg10[%c8, %c0_1] : memref<24x128xf32, #tpu.memory_space<vmem>>, vector<16x128xf32>
    %10 = vector.extract_strided_slice %9 {offsets = [8, 0], sizes = [8, 128], strides = [1, 1]} : vector<16x128xf32> to vector<8x128xf32>
    %c0_2 = arith.constant 0 : index
    %c0_3 = arith.constant 0 : index
    %c0_4 = arith.constant 0 : index
    %c0_5 = arith.constant 0 : index
    %11 = vector.load %arg9[%c0_2, %c0_3, %c0_4, %c0_5] : memref<1x1x8x128xf32, #tpu.memory_space<vmem>>, vector<1x1x8x128xf32>
    %12 = vector.shape_cast %11 : vector<1x1x8x128xf32> to vector<8x128xf32>
    %13 = vector.shape_cast %10 : vector<8x128xf32> to vector<1x1x8x128xf32>
    tpu.vector_store %arg9[%c0_2, %c0_3, %c0_4, %c0_5], %13 {strides = array<i32>} : memref<1x1x8x128xf32, #tpu.memory_space<vmem>>, vector<1x1x8x128xf32>,
    %c0_6 = arith.constant 0 : index
    %c4 = arith.constant 4 : index
    %c0_7 = arith.constant 0 : index
    %14 = vector.load %arg4[%c0_6, %c4, %c0_7] : memref<1x5x128xf32, #tpu.memory_space<vmem>>, vector<1x1x128xf32>
    %15 = vector.shape_cast %14 : vector<1x1x128xf32> to vector<128xf32>
    %16 = vector.shape_cast %15 : vector<128xf32> to vector<1x128xf32>
    %17 = vector.broadcast %16 : vector<1x128xf32> to vector<16x128xf32>
    %18 = arith.mulf %9, %17 : vector<16x128xf32>
    %c4_i32 = arith.constant 4 : i32
    %19 = arith.muli %4, %c4_i32 : i32
    %c8_i32 = arith.constant 8 : i32
    %20 = arith.subi %c8_i32, %19 : i32
    %21 = arith.index_cast %20 : i32 to index
    %c0_8 = arith.constant 0 : index
    %22 = vector.load %arg10[%21, %c0_8] : memref<24x128xf32, #tpu.memory_space<vmem>>, vector<16x128xf32>
    %c0_9 = arith.constant 0 : index
    %c0_10 = arith.constant 0 : index
    %c0_11 = arith.constant 0 : index
    %23 = vector.load %arg4[%c0_9, %c0_10, %c0_11] : memref<1x5x128xf32, #tpu.memory_space<vmem>>, vector<1x1x128xf32>
    %24 = vector.shape_cast %23 : vector<1x1x128xf32> to vector<128xf32>
    %25 = vector.shape_cast %24 : vector<128xf32> to vector<1x128xf32>
    %26 = vector.broadcast %25 : vector<1x128xf32> to vector<16x128xf32>
    %27 = arith.mulf %22, %26 : vector<16x128xf32>
    %28 = arith.addf %18, %27 : vector<16x128xf32>
    %c3_i32 = arith.constant 3 : i32
    %29 = arith.muli %4, %c3_i32 : i32
    %c8_i32_12 = arith.constant 8 : i32
    %30 = arith.subi %c8_i32_12, %29 : i32
    %31 = arith.index_cast %30 : i32 to index
    %c0_13 = arith.constant 0 : index
    %32 = vector.load %arg10[%31, %c0_13] : memref<24x128xf32, #tpu.memory_space<vmem>>, vector<16x128xf32>
    %c0_14 = arith.constant 0 : index
    %c1_15 = arith.constant 1 : index
    %c0_16 = arith.constant 0 : index
    %33 = vector.load %arg4[%c0_14, %c1_15, %c0_16] : memref<1x5x128xf32, #tpu.memory_space<vmem>>, vector<1x1x128xf32>
    %34 = vector.shape_cast %33 : vector<1x1x128xf32> to vector<128xf32>
    %35 = vector.shape_cast %34 : vector<128xf32> to vector<1x128xf32>
    %36 = vector.broadcast %35 : vector<1x128xf32> to vector<16x128xf32>
    %37 = arith.mulf %32, %36 : vector<16x128xf32>
    %38 = arith.addf %28, %37 : vector<16x128xf32>
    %c2_i32 = arith.constant 2 : i32
    %39 = arith.muli %4, %c2_i32 : i32
    %c8_i32_17 = arith.constant 8 : i32
    %40 = arith.subi %c8_i32_17, %39 : i32
    %41 = arith.index_cast %40 : i32 to index
    %c0_18 = arith.constant 0 : index
    %42 = vector.load %arg10[%41, %c0_18] : memref<24x128xf32, #tpu.memory_space<vmem>>, vector<16x128xf32>
    %c0_19 = arith.constant 0 : index
    %c2_20 = arith.constant 2 : index
    %c0_21 = arith.constant 0 : index
    %43 = vector.load %arg4[%c0_19, %c2_20, %c0_21] : memref<1x5x128xf32, #tpu.memory_space<vmem>>, vector<1x1x128xf32>
    %44 = vector.shape_cast %43 : vector<1x1x128xf32> to vector<128xf32>
    %45 = vector.shape_cast %44 : vector<128xf32> to vector<1x128xf32>
    %46 = vector.broadcast %45 : vector<1x128xf32> to vector<16x128xf32>
    %47 = arith.mulf %42, %46 : vector<16x128xf32>
    %48 = arith.addf %38, %47 : vector<16x128xf32>
    %c1_i32 = arith.constant 1 : i32
    %49 = arith.muli %4, %c1_i32 : i32
    %c8_i32_22 = arith.constant 8 : i32
    %50 = arith.subi %c8_i32_22, %49 : i32
    %51 = arith.index_cast %50 : i32 to index
    %c0_23 = arith.constant 0 : index
    %52 = vector.load %arg10[%51, %c0_23] : memref<24x128xf32, #tpu.memory_space<vmem>>, vector<16x128xf32>
    %c0_24 = arith.constant 0 : index
    %c3 = arith.constant 3 : index
    %c0_25 = arith.constant 0 : index
    %53 = vector.load %arg4[%c0_24, %c3, %c0_25] : memref<1x5x128xf32, #tpu.memory_space<vmem>>, vector<1x1x128xf32>
    %54 = vector.shape_cast %53 : vector<1x1x128xf32> to vector<128xf32>
    %55 = vector.shape_cast %54 : vector<128xf32> to vector<1x128xf32>
    %56 = vector.broadcast %55 : vector<1x128xf32> to vector<16x128xf32>
    %57 = arith.mulf %52, %56 : vector<16x128xf32>
    %58 = arith.addf %48, %57 : vector<16x128xf32>
    %c0_26 = arith.constant 0 : index
    %c0_27 = arith.constant 0 : index
    %c0_28 = arith.constant 0 : index
    %59 = vector.load %arg5[%c0_26, %c0_27, %c0_28] : memref<1x128x128xf32, #tpu.memory_space<vmem>>, vector<1x128x128xf32>
    %60 = vector.shape_cast %59 : vector<1x128x128xf32> to vector<128x128xf32>
    %cst = arith.constant dense<0.000000e+00> : vector<16x128xf32>
    %61 = tpu.matmul %58, %60, %cst {dimension_numbers = #tpu.dot_dimension_numbers<[1], [0], [0], [1], [0, 0, 1, 1], [], []>} : vector<16x128xf32>, vector<128x128xf32>, vector<16x128xf32> -> vector<16x128xf32>
    %c0_29 = arith.constant 0 : index
    %c0_30 = arith.constant 0 : index
    %c0_31 = arith.constant 0 : index
    %62 = vector.load %arg7[%c0_29, %c0_30, %c0_31] : memref<1x2x128xf32, #tpu.memory_space<vmem>>, vector<1x1x128xf32>
    %63 = vector.shape_cast %62 : vector<1x1x128xf32> to vector<128xf32>
    %64 = vector.shape_cast %63 : vector<128xf32> to vector<1x128xf32>
    %65 = vector.broadcast %64 : vector<1x128xf32> to vector<16x128xf32>
    %66 = arith.addf %61, %65 : vector<16x128xf32>
    %cst_32 = arith.constant 0.000000e+00 : f32
    %67 = vector.broadcast %cst_32 : f32 to vector<16x128xf32>
    %68 = arith.maximumf %66, %67 : vector<16x128xf32>
    %c0_33 = arith.constant 0 : index
    %c0_34 = arith.constant 0 : index
    %c0_35 = arith.constant 0 : index
    %69 = vector.load %arg6[%c0_33, %c0_34, %c0_35] : memref<1x128x128xf32, #tpu.memory_space<vmem>>, vector<1x128x128xf32>
    %70 = vector.shape_cast %69 : vector<1x128x128xf32> to vector<128x128xf32>
    %cst_36 = arith.constant dense<0.000000e+00> : vector<16x128xf32>
    %71 = tpu.matmul %68, %70, %cst_36 {dimension_numbers = #tpu.dot_dimension_numbers<[1], [0], [0], [1], [0, 0, 1, 1], [], []>} : vector<16x128xf32>, vector<128x128xf32>, vector<16x128xf32> -> vector<16x128xf32>
    %c0_37 = arith.constant 0 : index
    %c1_38 = arith.constant 1 : index
    %c0_39 = arith.constant 0 : index
    %72 = vector.load %arg7[%c0_37, %c1_38, %c0_39] : memref<1x2x128xf32, #tpu.memory_space<vmem>>, vector<1x1x128xf32>
    %73 = vector.shape_cast %72 : vector<1x1x128xf32> to vector<128xf32>
    %74 = vector.shape_cast %73 : vector<128xf32> to vector<1x128xf32>
    %75 = vector.broadcast %74 : vector<1x128xf32> to vector<16x128xf32>
    %76 = arith.addf %71, %75 : vector<16x128xf32>
    %c1_i32_40 = arith.constant 1 : i32
    %77 = arith.cmpi eq, %6, %c1_i32_40 : i32
    %78 = arith.addf %76, %9 : vector<16x128xf32>
    %79 = arith.select %77, %78, %76 : vector<16x128xf32>
    %cst_41 = arith.constant 0.000000e+00 : f32
    %80 = vector.broadcast %cst_41 : f32 to vector<16x128xf32>
    %81 = arith.maximumf %79, %80 : vector<16x128xf32>
    %c8_42 = arith.constant 8 : index
    %c0_43 = arith.constant 0 : index
    %82 = vector.load %arg10[%c8_42, %c0_43] : memref<24x128xf32, #tpu.memory_space<vmem>>, vector<16x128xf32>
    tpu.vector_store %arg10[%c8_42, %c0_43], %81 {strides = array<i32>} : memref<24x128xf32, #tpu.memory_space<vmem>>, vector<16x128xf32>,
    %c1_i32_44 = arith.constant 1 : i32
    %83 = arith.cmpi eq, %8, %c1_i32_44 : i32
    %84 = arith.extui %83 : i1 to i32
    %c0_i32_45 = arith.constant 0 : i32
    %85 = arith.cmpi ne, %84, %c0_i32_45 : i32
    scf.if %85 {
      %c0_46 = arith.constant 0 : index
      %c0_47 = arith.constant 0 : index
      %c0_48 = arith.constant 0 : index
      %86 = vector.load %arg8[%c0_46, %c0_47, %c0_48] : memref<1x16x128xf32, #tpu.memory_space<vmem>>, vector<1x16x128xf32>
      %87 = vector.shape_cast %86 : vector<1x16x128xf32> to vector<16x128xf32>
      %88 = arith.addf %87, %81 : vector<16x128xf32>
      %c0_49 = arith.constant 0 : index
      %c0_50 = arith.constant 0 : index
      %c0_51 = arith.constant 0 : index
      %89 = vector.load %arg8[%c0_49, %c0_50, %c0_51] : memref<1x16x128xf32, #tpu.memory_space<vmem>>, vector<1x16x128xf32>
      %90 = vector.shape_cast %89 : vector<1x16x128xf32> to vector<16x128xf32>
      %91 = vector.shape_cast %88 : vector<16x128xf32> to vector<1x16x128xf32>
      tpu.vector_store %arg8[%c0_49, %c0_50, %c0_51], %91 {strides = array<i32>} : memref<1x16x128xf32, #tpu.memory_space<vmem>>, vector<1x16x128xf32>,
    } else {
    }
    return
  }
  func.func @transform_0(%arg0: i32, %arg1: i32, %arg2: memref<5x3xi32, #tpu.memory_space<smem>>) -> (i32, i32, i32) {
    %c0_i32 = arith.constant 0 : i32
    %c0_i32_0 = arith.constant 0 : i32
    %c0_i32_1 = arith.constant 0 : i32
    return %arg0, %c0_i32, %c0_i32_0 : i32, i32, i32
  }
  func.func @transform_1(%arg0: i32, %arg1: i32, %arg2: memref<5x3xi32, #tpu.memory_space<smem>>) -> (i32, i32, i32) {
    %c0_i32 = arith.constant 0 : i32
    %c0_i32_0 = arith.constant 0 : i32
    %c0_i32_1 = arith.constant 0 : i32
    return %arg1, %c0_i32, %c0_i32_0 : i32, i32, i32
  }
  func.func @transform_2(%arg0: i32, %arg1: i32, %arg2: memref<5x3xi32, #tpu.memory_space<smem>>) -> (i32, i32, i32) {
    %c0_i32 = arith.constant 0 : i32
    %c0_i32_0 = arith.constant 0 : i32
    %c0_i32_1 = arith.constant 0 : i32
    return %arg1, %c0_i32, %c0_i32_0 : i32, i32, i32
  }
  func.func @transform_3(%arg0: i32, %arg1: i32, %arg2: memref<5x3xi32, #tpu.memory_space<smem>>) -> (i32, i32, i32) {
    %c0_i32 = arith.constant 0 : i32
    %c0_i32_0 = arith.constant 0 : i32
    %c0_i32_1 = arith.constant 0 : i32
    return %arg1, %c0_i32, %c0_i32_0 : i32, i32, i32
  }
  func.func @transform_4(%arg0: i32, %arg1: i32, %arg2: memref<5x3xi32, #tpu.memory_space<smem>>) -> (i32, i32, i32) {
    %c0_i32 = arith.constant 0 : i32
    %c0_i32_0 = arith.constant 0 : i32
    %c0_i32_1 = arith.constant 0 : i32
    return %arg1, %c0_i32, %c0_i32_0 : i32, i32, i32
  }
  func.func @transform_5(%arg0: i32, %arg1: i32, %arg2: memref<5x3xi32, #tpu.memory_space<smem>>) -> (i32, i32, i32) {
    %c0_i32 = arith.constant 0 : i32
    %c0_i32_0 = arith.constant 0 : i32
    %c0_i32_1 = arith.constant 0 : i32
    return %arg0, %c0_i32, %c0_i32_0 : i32, i32, i32
  }
  func.func @transform_6(%arg0: i32, %arg1: i32, %arg2: memref<5x3xi32, #tpu.memory_space<smem>>) -> (i32, i32, i32, i32) {
    %c0_i32 = arith.constant 0 : i32
    %c0_i32_0 = arith.constant 0 : i32
    %c0_i32_1 = arith.constant 0 : i32
    return %arg1, %arg0, %c0_i32, %c0_i32_0 : i32, i32, i32, i32
  }
}

</mosaic_0001>

<bundles_post_ra>
// kernel: mdtc_forward.1
= control target key start
LH: loop header
LB: loop body
LE: loop exit
PB: predicated region body
PF: predicated region fallthrough
CT: control target
= control target key end

     0   :  { %s1889_s0 = inlined_call_operand.vmem [shape: s32[5,3], index: 0, kind: input, shape index: {}]   ;;  %s1890_s1 = inlined_call_operand.vmem [shape: f32[2,16,128], index: 1, kind: input, shape index: {}]   ;;  %s1891_s2 = inlined_call_operand.vmem [shape: f32[5,5,128], index: 2, kind: input, shape index: {}]   ;;  %s1892_s3 = inlined_call_operand.hbm [shape: f32[5,128,128], index: 3, kind: input, shape index: {}]   ;;  %s1893_s4 = inlined_call_operand.hbm [shape: f32[5,128,128], index: 4, kind: input, shape index: {}]   ;;  %s1894_s5 = inlined_call_operand.vmem [shape: f32[5,2,128], index: 5, kind: input, shape index: {}]   ;;  %s1895_s6 = inlined_call_operand.hbm [shape: f32[2,16,128], index: 6, kind: output, shape index: {0}]   ;;  %s1896_s7 = inlined_call_operand.vmem [shape: f32[5,2,8,128], index: 7, kind: output, shape index: {1}]  }
   0x1   :  { %1914 = sst [smem:[#allocation27_spill]] %s1892_s3  ;;  %s13_s26 = sshll.u32 %s1889_s0, 4  ;;  %s14_s26 = int_to_ptr.vmem [resolvable:$true] %s13_s26 }
   0x2   :  { %1915 = sst [smem:[#allocation28_spill]] %s1893_s4  ;;  %s1234_s27 = scalar_lea.vmem %s14_s26, 128 }
   0x3   :  { %p1235_p0 = scmp.ne.s32.totalorder %s14_s26, %s1234_s27  ;;  %p1239_p1 = scmp.lt.s32.totalorder %s14_s26, %s14_s26 }
   0x4   :  { %p1240_p2 = scmp.lt.s32.totalorder %s1234_s27, %s1234_s27 }
   0x6   :  { %p1241_p3 = por %p1240_p2, %p1239_p1 }
   0x8   :  { %p1242_p4 = pnand %p1241_p3, %p1235_p0 }
   0xa   :  { %1245 = shalt.err (!%p1242_p4)  }
   0xb   :  { %s1436_s28 = smov [#allocation4]  }
   0xc   :  { %16 = dma.vmem_to_smem %s14_s26, 128, %s1436_s28, [#allocation3] }
   0xd   :  { %1378 = dma.done.wait [#allocation3], 128 }
   0xe   :  { %1379 = vsyncadd [#allocation3], 4294967168 }
   0xf   :  { %18 = sfence }
  0x10   :  { %19 = vsyncpa [#allocation6], 0 }
  0x11   :  { %21 = vsyncpa [#allocation6 + $0x1], 0 }
  0x12   :  { %22 = vsyncpa [#allocation9], 0 }
  0x13   :  { %24 = vsyncpa [#allocation9 + $0x1], 0 }
  0x14   :  { %25 = vsyncpa [#allocation7], 0 }
  0x15   :  { %27 = vsyncpa [#allocation7 + $0x1], 0  ;;  %s1488_s0 = smov 0   ;;  %s1490_s29 = smov 0  }
  0x16   :  { %s1492_s30 = smov 0   ;;  %s1494_s8 = smov 0  }
  0x17   :  { %s1496_s9 = smov 0   ;;  %s1498_s10 = smov 0  }
  0x18   :  { %s1500_s11 = smov 0   ;;  %s1502_s12 = smov 0  }
  0x19   :  { %s1504_s13 = smov 0   ;;  %s1506_s14 = smov 0  }
  0x1a   :  { %s1508_s15 = smov 0  }
  0x1b LB: > { %1916 = sst [smem:[#allocation15_spill]] %s1394_s0  ;;  %s910_s16 = sadd.s32 4294967295, %s1434_s15   ;;  %s1434_s15 = sphi %s1508_s15, %s33_s15   ;;  %s1430_s14 = sphi %s1506_s14, %s1955_s14   ;;  %s1426_s13 = sphi %s1504_s13, %s1958_s13   ;;  %s1422_s12 = sphi %s1502_s12, %s1953_s12   ;;  %s1418_s11 = sphi %s1500_s11, %s1952_s11   ;;  %s1414_s10 = sphi %s1498_s10, %s1951_s10   ;;  %s1410_s9 = sphi %s1496_s9, %s1950_s9   ;;  %s1406_s8 = sphi %s1494_s8, %s1949_s8   ;;  %s1402_s30 = sphi %s1492_s30, %s1948_s30   ;;  %s1398_s29 = sphi %s1490_s29, %s1957_s29   ;;  %s1394_s0 = sphi %s1488_s0, %s1956_s0  }
  0x1c   : > { %1917 = sst [smem:[#allocation16_spill]] %s1402_s30  ;;  %s911_s17 = sadd.s32 4294967294, %s1434_s15  }
  0x1d   : > { %1918 = sst [smem:[#allocation17_spill]] %s1410_s9  ;;  %s42_s18 = sadd.s32 1, %s1426_s13 }
  0x1e   : > { %1919 = sst [smem:[#allocation18_spill]] %s1414_s10  ;;  %s45_s19 = sadd.s32 1, %s1430_s14 }
  0x1f   : > { %1920 = sst [smem:[#allocation19_spill]] %s1426_s13  ;;  %p43_p5 = scmp.ge.s32.totalorder %s42_s18, 5 }
  0x20   : > { %1921 = sst [smem:[#allocation20_spill]] %s1430_s14  ;;  %s104_s20 = sadd.s32 1, %s1414_s10 }
  0x21   : > { %1922 = sst [smem:[#allocation21_spill]] %s1434_s15  ;;  %p111_p6 = scmp.ne.s32.totalorder %s1414_s10, %s1410_s9 }
  0x22   : > { %p112_p7 = scmp.eq.s32.totalorder %s1434_s15, 0  ;;  %s1960_s18 = smov (%p43_p5, %s42_s18), 0 }
  0x23   : > { %1923 = sst [smem:[#allocation22_spill]] %s1960_s18  ;;  %s1962_s19 = smov (!%p43_p5, %s45_s19), %s1430_s14 }
  0x24   : > { %s101_s21 = ssub.s32 %s1426_s13, %s1960_s18  ;;  %p1554_p8 = por %p112_p7, %p111_p6 }
  0x25   : > { %p47_p9 = scmp.ge.s32.totalorder %s1962_s19, 2  ;;  %p102_p10 = scmp.eq.s32.totalorder %s101_s21, 0 }
  0x26   : > { %p117_p11 = scmp.ne.s32.totalorder %s1410_s9, %s1406_s8  ;;  %p118_p12 = scmp.eq.s32.totalorder %s910_s16, 0 }
  0x27   : > { %s1964_s19 = smov (%p47_p9, %s1962_s19), 0  ;;  %s182_s26 = sadd.s32 1, %s1402_s30 }
  0x28   : > { %1925 = sst [smem:[#allocation23_spill]] %s1964_s19  ;;  %p1564_p13 = por %p118_p12, %p117_p11 }
  0x29   : > { %s1562_s23 = scalar_select %p102_p10, %s1414_s10, %s104_s20  }
  0x2a   : > { %s1927_s24 = scalar_select %p1564_p13, 1, 0 }
  0x2b   : > { %1926 = sst [smem:[#allocation24_spill]] %s1562_s23  ;;  %s179_s25 = ssub.s32 %s1430_s14, %s1964_s19 }
  0x2c   : > { %p180_p0 = scmp.eq.s32.totalorder %s179_s25, 0  ;;  %p192_p1 = scmp.ne.s32.totalorder %s1402_s30, %s1398_s29 }
  0x2d   : > { %p193_p2 = scmp.eq.s32.totalorder %s910_s16, 9  ;;  %p198_p4 = scmp.ne.s32.totalorder %s1398_s29, %s1394_s0 }
  0x2e   : > { %s1574_s27 = scalar_select %p180_p0, %s1402_s30, %s182_s26  }
  0x2f   : > { %p1576_p3 = por %p193_p2, %p192_p1  ;;  %p199_p5 = scmp.eq.s32.totalorder %s911_s17, 9 }
  0x30   : > { %1928 = sst [smem:[#allocation25_spill]] %s1574_s27  ;;  %p1138_p6 = scmp.lt.s32.totalorder %s1434_s15, 10 }
  0x31   : > { %s1929_s28 = scalar_select %p1576_p3, 1, 0 }
  0x32   : > { %s1584_s8 = sand.u32 1, %s1414_s10   ;;  %p1586_p7 = por %p199_p5, %p198_p4 }
  0x33   : > { %s1900_s21 = sshll.u32 %s1584_s8, 7  ;;  %s1901_s16 = sshll.u32 %s1426_s13, 11 }
  0x34   : > { %s1930_s20 = scalar_select %p1586_p7, 1, 0 }
  0x35   : > { %s1932_s3 = sld [smem:[#allocation27_spill]]  ;;  %s266_s17 = scalar_lea.vmem [#allocation5], %s1900_s21 }
  0x36   : > { %1931 = sst [smem:[#allocation26_spill]] %s1930_s20  ;;  %s273_s18 = sshll.u32 %s266_s17, 4  ;;  %s1607_s18 = int_to_ptr.vmem [resolvable:$true] %s273_s18 }
  0x37   : > { %p1603_p9 = pnand %p1138_p6, %p1554_p8 }
  0x39   : > { %p1248_p11 = pneg %p1603_p9 }
  0x3b   : > { %s1597_s19 = scalar_lea.hbm %s1932_s3, %s1901_s16  ;;  %s1251_s22 = scalar_lea.hbm %s1932_s3, 10240 }
  0x3c   : > { %s1246_s25 = scalar_lea.hbm %s1597_s19, 2048  ;;  %p1252_p8 = scmp.lt.u32.totalorder %s1597_s19, %s1932_s3 }
  0x3d   : > { %p1247_p10 = scmp.ne.s32.totalorder %s1597_s19, %s1246_s25  ;;  %p1253_p1 = scmp.lt.u32.totalorder %s1251_s22, %s1246_s25 }
  0x3e   : > { %p1255_p4 = scmp.lt.u32.totalorder %s1246_s25, %s1597_s19 }
  0x3f   : > { %p1249_p12 = pnand %p1248_p11, %p1247_p10  ;;  %p1254_p2 = por %p1253_p1, %p1252_p8 }
  0x41   : > { %p1250_p0 = pneg %p1249_p12  ;;  %p1256_p5 = por %p1255_p4, %p1254_p2 }
  0x43   : > { %p1257_p6 = pnand %p1256_p5, %p1250_p0 }
  0x45   : > { %1260 = shalt.err (!%p1257_p6)
}
  0x46   : > { %s1261_s23 = scalar_lea.vmem %s1607_s18, 2048  ;;  %s1437_s26 = smov [#allocation5]  }
  0x47   : > { %p1262_p10 = scmp.ne.s32.totalorder %s1607_s18, %s1261_s23  ;;  %s1266_s17 = sshll.u32 %s1437_s26, 4  ;;  %s1267_s17 = int_to_ptr.vmem [resolvable:$false] %s1266_s17 }
  0x48   : > { %s1268_s21 = scalar_lea.vmem %s1267_s17, 4096  ;;  %p1269_p3 = scmp.lt.s32.totalorder %s1607_s18, %s1267_s17 }
  0x49   : > { %p1264_p12 = pnand %p1262_p10, %p1248_p11  ;;  %p1270_p8 = scmp.lt.s32.totalorder %s1268_s21, %s1261_s23 }
  0x4b   : > { %p1265_p7 = pneg %p1264_p12  ;;  %p1271_p1 = por %p1270_p8, %p1269_p3 }
  0x4d   : > { %p1272_p2 = pnand %p1271_p1, %p1265_p7 }
  0x4f   : > { %1275 = shalt.err (!%p1272_p2)
}
  0x50   : > { %s1905_s16 = smov 128   ;;  %s1439_s25 = smov 8  }
  0x51   : > { %s1934_s23 = scalar_lea.sflag [#allocation6], %s1584_s8  ;;  %p920_p3 = scmp.ge.s32.totalorder %s1434_s15, 1 }
  0x52   : > { %1130 = dma.hbm_to_vmem [thread:$0]  (!%p1603_p9), %s1597_s19, 2048, %s1607_s18, %s1934_s23, %s1905_s16, %s1905_s16, %s1439_s25  }
  0x53   : > { %p309_p7 = scmp.lt.s32.totalorder %s1434_s15, 11  ;;  %s1936_s26 = sshll.u32 %s1426_s13, 11 }
  0x54   : > { %s1937_s4 = sld [smem:[#allocation28_spill]]  ;;  %s1938_s10 = sshll.u32 %s1584_s8, 7 }
  0x55   : > { %p1642_p0 = pnand %p920_p3, %p309_p7  ;;  %s287_s27 = scalar_lea.vmem [#allocation8], %s1938_s10 }
  0x56   : > { %s294_s30 = sshll.u32 %s287_s27, 4  ;;  %s284_s18 = scalar_lea.sflag [#allocation9], %s1584_s8  ;;  %s1655_s30 = int_to_ptr.vmem [resolvable:$true] %s294_s30 }
  0x5a   : > { %s1651_s3 = scalar_lea.hbm %s1937_s4, %s1936_s26  ;;  %s1281_s26 = scalar_lea.hbm %s1937_s4, 10240 }
  0x5b   : > { %s1276_s19 = scalar_lea.hbm %s1651_s3, 2048  ;;  %p1282_p10 = scmp.lt.u32.totalorder %s1651_s3, %s1937_s4 }
  0x5c   : > { %p1277_p4 = scmp.ne.s32.totalorder %s1651_s3, %s1276_s19  ;;  %p1283_p12 = scmp.lt.u32.totalorder %s1281_s26, %s1276_s19 }
  0x5d   : > { %p1285_p1 = scmp.lt.u32.totalorder %s1276_s19, %s1651_s3 }
  0x5e   : > { %p1279_p5 = pnand %p1277_p4, %p1248_p11  ;;  %p1284_p8 = por %p1283_p12, %p1282_p10 }
  0x60   : > { %p1280_p6 = pneg %p1279_p5  ;;  %p1286_p2 = por %p1285_p1, %p1284_p8 }
  0x62   : > { %p1287_p3 = pnand %p1286_p2, %p1280_p6 }
  0x64   : > { %1290 = shalt.err (!%p1287_p3)
}
  0x65   : > { %s1291_s10 = scalar_lea.vmem %s1655_s30, 2048  ;;  %s1440_s27 = smov [#allocation8]  }
  0x66   : > { %p1292_p7 = scmp.ne.s32.totalorder %s1655_s30, %s1291_s10  ;;  %s1296_s23 = sshll.u32 %s1440_s27, 4  ;;  %s1297_s23 = int_to_ptr.vmem [resolvable:$false] %s1296_s23 }
  0x67   : > { %s1298_s16 = scalar_lea.vmem %s1297_s23, 4096  ;;  %p1299_p13 = scmp.lt.s32.totalorder %s1655_s30, %s1297_s23 }
  0x68   : > { %p1294_p4 = pnand %p1292_p7, %p1248_p11  ;;  %p1300_p10 = scmp.lt.s32.totalorder %s1298_s16, %s1291_s10 }
  0x6a   : > { %p1295_p5 = pneg %p1294_p4  ;;  %p1301_p12 = por %p1300_p10, %p1299_p13 }
  0x6c   : > { %p1302_p8 = pnand %p1301_p12, %p1295_p5 }
  0x6e   : > { %1305 = shalt.err (!%p1302_p8)
}
  0x6f   : > { %s1939_s19 = smov 128   ;;  %313 = sbr.rel (%p1642_p0) target bundleno = 640 (0x280), region = 40 }
  0x70   : > { %1133 = dma.hbm_to_vmem [thread:$0]  (!%p1603_p9), %s1651_s3, 2048, %s1655_s30, %s284_s18, %s1939_s19, %s1939_s19, %s1439_s25  }
  0x71   : > { %s315_s17 = sand.u32 (!%p1642_p0), 1, %s1410_s9   ;;  %p1940_p13 = scmp.ne.s32.totalorder (!%p1642_p0), %s1927_s24, 0 }
  0x72   : > { %s921_s26 = sshll.u32 (!%p1642_p0), %s315_s17, 7  ;;  %s316_s21 = scalar_lea.sflag (!%p1642_p0), [#allocation6], %s315_s17 }
  0x73   : > { %s1689_s10 = scalar_lea.vmem (!%p1642_p0), [#allocation5], %s921_s26 }
  0x76   : > { %1381 = dma.done.wait (%p1940_p13), %s316_s21, 2048  }
  0x77   : > { %1383 = vsyncadd (%p1940_p13), %s316_s21, 4294965248  ;;  %s325_s14 = scalar_lea.sflag [#allocation9], %s315_s17  ;;  %s1695_s8 = scalar_lea.vmem [#allocation8], %s921_s26 }
  0x78   : > { %1385 = dma.done.wait (%p1940_p13), %s325_s14, 2048  }
  0x79   : > { %1387 = vsyncadd (%p1940_p13), %s325_s14, 4294965248  ;;  %s1908_s3 = sand.u32 1, %s1398_s29   ;;  %p383_p9 = scmp.lt.s32.totalorder %s1422_s12, 1 }
  0x7a   : > { %s923_s30 = sshll.u32 %s1908_s3, 4  ;;  %p388_p11 = scmp.lt.s32.totalorder %s1418_s11, 4 }
  0x7b   : > { %s384_s25 = scalar_select %p383_p9, %s1422_s12, 1 }
  0x7c   : > { %s389_s22 = scalar_select %p388_p11, %s1418_s11, 4 }
  0x7d   : > { %s949_s18 = sshll.u32 %s384_s25, 4  ;;  %p930_p0 = scmp.ne.s32.totalorder %s1418_s11, 0 }
  0x7e   : > { %s387_s16 = scalar_lea.vmem %s1890_s1, %s949_s18  ;;  %s926_s24 = sshll.u32 %s389_s22, 3  ;;  %v1441_v2 = vmov (!%p930_p0), 0.0  }
  0x7f   : > { %s1714_s26 = scalar_lea.vmem %s1891_s2, %s926_s24  ;;  %s927_s21 = sshll.u32 %s389_s22, 1  ;;  %v409_v0 = vld [vmem:[%s387_s16] sm:$0xff] (!%p930_p0)  ;;  %v410_v1 = vld [vmem:[%s387_s16 + $0x8] sm:$0xff] (!%p930_p0)  ;;  %408 = vst [vmem:[#allocation2] sm:$0xff] (!%p930_p0), %v1441_v2 }
  0x80   : > { %s1719_s13 = scalar_lea.vmem %s1894_s5, %s927_s21  ;;  %s401_s3 = sadd.s32 %s927_s21, %s384_s25  ;;  %411 = vst [vmem:[#allocation2 + $0x8] sm:$0xff] (!%p930_p0), %v409_v0  ;;  %412 = vst [vmem:[#allocation2 + $0x10] sm:$0xff] (!%p930_p0), %v410_v1 }
  0x81   : > { %s929_s9 = sshll.u32 %s401_s3, 3  ;;  %s1726_s18 = scalar_lea.vmem [#allocation10], %s923_s30 }
  0x82   : > { %s1724_s15 = scalar_lea.vmem %s1896_s7, %s929_s9  ;;  %407 = sbr.rel (%p930_p0) target bundleno = 137 (0x89), region = 52  ;;  %413 = vst [vmem:[%s1726_s18] sm:$0xff] (!%p930_p0), %v1441_v2  ;;  %414 = vst [vmem:[%s1726_s18 + $0x8] sm:$0xff] (!%p930_p0), %v1441_v2 }
  0x89 PF: > { %v486_v3 = vld [vmem:[%s1689_s10] sm:$0xff]  ;;  %v487_v4 = vld [vmem:[%s1689_s10 + $0x8] sm:$0xff]  ;;  %v488_v5 = vld [vmem:[%s1689_s10 + $0x10] sm:$0xff]  ;;  %s1735_s4 = sshll.u32 %s1418_s11, 7 }
  0x8a   : > { %v1057_v6 = vpack.c.bf16 %v487_v4, %v486_v3  ;;  %v489_v7 = vld [vmem:[%s1689_s10 + $0x18] sm:$0xff]  ;;  %s1739_s0 = sld [smem:[#allocation4 + %s1735_s4]]  ;;  %s419_s9 = sadd.s32 2, %s1735_s4  ;;  %v490_v9 = vld [vmem:[%s1689_s10 + $0x20] sm:$0xff]  ;;  %v491_v10 = vld [vmem:[%s1689_s10 + $0x28] sm:$0xff] }
  0x8b   : > { %v1061_v8 = vpack.c.bf16 %v489_v7, %v488_v5  ;;  %s1744_s20 = sld [smem:[#allocation4 + %s419_s9]]  ;;  %v1065_v11 = vpack.c.bf16 %v491_v10, %v490_v9  ;;  %v492_v12 = vld [vmem:[%s1689_s10 + $0x30] sm:$0xff]  ;;  %v1747_v13 = vld [vmem:[#allocation2 + $0x10] sm:$0xff]  ;;  %v932_v16 = vld [vmem:[%s1714_s26 + $0x4] ss:$0 sm:$0xff] }
  0x8c   : > { %1058 = vmatprep.subr.bf16.mxu0 %v1057_v6  ;;  %v493_v14 = vld [vmem:[%s1689_s10 + $0x38] sm:$0xff]  ;;  %v1750_v15 = vld [vmem:[#allocation2 + $0x8] sm:$0xff]  ;;  %423 = vst [vmem:[%s1724_s15] sm:$0xff] %v1747_v13  ;;  %v934_v17 = vld [vmem:[%s1714_s26] ss:$0 sm:$0xff]  ;;  %v430_v46 = vmul.f32 %v932_v16, %v1747_v13 }
  0x8d   : > { %1060 = vmatpush3.bf16.msra.mxu0 %v1057_v6  ;;  %v935_v18 = vld [vmem:[%s1714_s26 + $0x1] ss:$0 sm:$0xff]  ;;  %v494_v19 = vld [vmem:[%s1689_s10 + $0x40] sm:$0xff]  ;;  %v586_v22 = vld [vmem:[%s1695_s8 + $0x10] sm:$0xff]  ;;  %v1069_v23 = vpack.c.bf16 %v493_v14, %v492_v12  ;;  %v429_v25 = vmul.f32 %v932_v16, %v1750_v15 }
  0x8e   : > { %1062 = vmatprep.subr.bf16.mxu0 %v1061_v8  ;;  %v584_v20 = vld [vmem:[%s1695_s8] sm:$0xff]  ;;  %v585_v21 = vld [vmem:[%s1695_s8 + $0x8] sm:$0xff]  ;;  %v587_v28 = vld [vmem:[%s1695_s8 + $0x18] sm:$0xff] }
  0x8f   : > { %v495_v24 = vld [vmem:[%s1689_s10 + $0x48] sm:$0xff]  ;;  %v1089_v27 = vpack.c.bf16 %v585_v21, %v584_v20  ;;  %v1093_v30 = vpack.c.bf16 %v587_v28, %v586_v22  ;;  %v588_v31 = vld [vmem:[%s1695_s8 + $0x20] sm:$0xff]  ;;  %v496_v44 = vld [vmem:[%s1689_s10 + $0x50] sm:$0xff] }
  0x90   : > { %s933_s11 = sshll.u32 %s1739_s0, 2  ;;  %s445_s3 = smul.u32 3, %s1739_s0  ;;  %v1769_v26 = vld [vmem:[%s1714_s26 + $0x2] ss:$0 sm:$0xff]  ;;  %v938_v38 = vld [vmem:[%s1714_s26 + $0x3] ss:$0 sm:$0xff]  ;;  %v1073_v39 = vpack.c.bf16 %v495_v24, %v494_v19 }
  0x91   : > { %1064 = vmatpush3.bf16.msra.mxu0 %v1061_v8  ;;  %s432_s30 = ssub.s32 8, %s933_s11  ;;  %s936_s25 = sshll.u32 %s1739_s0, 1  ;;  %v589_v32 = vld [vmem:[%s1695_s8 + $0x28] sm:$0xff]  ;;  %1090 = vmatprep.subr.bf16.mxu1 %v1089_v27  ;;  %v497_v45 = vld [vmem:[%s1689_s10 + $0x58] sm:$0xff]  ;;  %v590_v50 = vld [vmem:[%s1695_s8 + $0x30] sm:$0xff] }
  0x92   : > { %1066 = vmatprep.subr.bf16.mxu0 %v1065_v11  ;;  %s1766_s15 = ssub.s32 8, %s445_s3  ;;  %s433_s22 = scalar_lea.vmem [#allocation2], %s432_s30  ;;  %1092 = vmatpush3.bf16.msra.mxu1 %v1089_v27  ;;  %v1097_v43 = vpack.c.bf16 %v589_v32, %v588_v31  ;;  %v591_v51 = vld [vmem:[%s1695_s8 + $0x38] sm:$0xff]  ;;  %v1077_v53 = vpack.c.bf16 %v497_v45, %v496_v44  ;;  %v498_v54 = vld [vmem:[%s1689_s10 + $0x60] sm:$0xff]  ;;  %v499_v56 = vld [vmem:[%s1689_s10 + $0x68] sm:$0xff] }
  0x93   : > { %v434_v29 = vld [vmem:[%s433_s22] sm:$0xff]  ;;  %s1772_s27 = ssub.s32 8, %s936_s25  ;;  %s447_s23 = scalar_lea.vmem [#allocation2], %s1766_s15  ;;  %v435_v35 = vld [vmem:[%s433_s22 + $0x8] sm:$0xff]  ;;  %1094 = vmatprep.subr.bf16.mxu1 %v1093_v30  ;;  %v1101_v57 = vpack.c.bf16 %v591_v51, %v590_v50  ;;  %v592_v58 = vld [vmem:[%s1695_s8 + $0x40] sm:$0xff]  ;;  %v1081_v0 = vpack.c.bf16 %v499_v56, %v498_v54 }
  0x94   : > { %v441_v33 = vmul.f32 %v934_v17, %v434_v29  ;;  %v448_v34 = vld [vmem:[%s447_s23] sm:$0xff]  ;;  %s473_s16 = ssub.s32 8, %s1739_s0  ;;  %s461_s24 = scalar_lea.vmem [#allocation2], %s1772_s27  ;;  %v442_v47 = vmul.f32 %v934_v17, %v435_v35  ;;  %v449_v52 = vld [vmem:[%s447_s23 + $0x8] sm:$0xff]  ;;  %v501_v3 = vld [vmem:[%s1689_s10 + $0x78] sm:$0xff] }
  0x95   : > { %1068 = vmatpush3.bf16.msra.mxu0 %v1065_v11  ;;  %v455_v36 = vmul.f32 %v935_v18, %v448_v34  ;;  %v462_v37 = vld [vmem:[%s461_s24] sm:$0xff]  ;;  %s1783_s19 = scalar_lea.vmem [#allocation2], %s473_s16  ;;  %v456_v60 = vmul.f32 %v935_v18, %v449_v52  ;;  %v463_v63 = vld [vmem:[%s461_s24 + $0x8] sm:$0xff]  ;;  %v595_v5 = vld [vmem:[%s1695_s8 + $0x58] sm:$0xff]  ;;  %p941_p1 = scmp.ne.s32.totalorder %s1744_s20, 1 }
  0x96   : > { %1070 = vmatprep.subr.bf16.mxu0 %v1069_v23  ;;  %v443_v40 = vadd.f32 %v441_v33, %v429_v25  ;;  %v469_v41 = vmul.f32 %v1769_v26, %v462_v37  ;;  %v475_v42 = vld [vmem:[%s1783_s19] sm:$0xff]  ;;  %1096 = vmatpush3.bf16.msra.mxu1 %v1093_v30  ;;  %v444_v62 = vadd.f32 %v442_v47, %v430_v46  ;;  %v500_v1 = vld [vmem:[%s1689_s10 + $0x70] sm:$0xff]  ;;  %v596_v11 = vld [vmem:[%s1695_s8 + $0x60] sm:$0xff]  ;;  %s417_s10 = sadd.s32 1, %s1735_s4 }
  0x97   : > { %v482_v49 = vmul.f32 %v938_v38, %v475_v42  ;;  %1098 = vmatprep.subr.bf16.mxu1 %v1097_v43  ;;  %v593_v59 = vld [vmem:[%s1695_s8 + $0x48] sm:$0xff]  ;;  %v594_v4 = vld [vmem:[%s1695_s8 + $0x50] sm:$0xff]  ;;  %v470_v6 = vmul.f32 %v1769_v26, %v463_v63  ;;  %v1085_v9 = vpack.c.bf16 %v501_v3, %v500_v1  ;;  %v599_v20 = vld [vmem:[%s1695_s8 + $0x78] sm:$0xff]  ;;  %s418_s17 = sld [smem:[#allocation4 + %s417_s10]] }
  0x98   : > { %v457_v48 = vadd.f32 %v455_v36, %v443_v40  ;;  %v1105_v2 = vpack.c.bf16 %v593_v59, %v592_v58  ;;  %v458_v7 = vadd.f32 %v456_v60, %v444_v62  ;;  %v476_v8 = vld [vmem:[%s1783_s19 + $0x8] sm:$0xff]  ;;  %v1109_v10 = vpack.c.bf16 %v595_v5, %v594_v4  ;;  %v597_v12 = vld [vmem:[%s1695_s8 + $0x68] sm:$0xff] }
  0x99   : > { %1072 = vmatpush3.bf16.msra.mxu0 %v1069_v23  ;;  %v483_v14 = vmul.f32 %v938_v38, %v476_v8  ;;  %v1113_v17 = vpack.c.bf16 %v597_v12, %v596_v11  ;;  %v598_v19 = vld [vmem:[%s1695_s8 + $0x70] sm:$0xff]  ;;  %v939_v22 = vld [vmem:[%s1719_s13] ss:$0 sm:$0xff]  ;;  %v940_v29 = vld [vmem:[%s1719_s13 + $0x1] ss:$0 sm:$0xff] }
  0x9a   : > { %1074 = vmatprep.subr.bf16.mxu0 %v1073_v39  ;;  %v471_v55 = vadd.f32 %v469_v41, %v457_v48  ;;  %1100 = vmatpush3.bf16.msra.mxu1 %v1097_v43  ;;  %v472_v16 = vadd.f32 %v470_v6, %v458_v7  ;;  %v1117_v21 = vpack.c.bf16 %v599_v20, %v598_v19  ;;  %v696_v41 = vld [vmem:[%s1726_s18] sm:$0xff] (!%p941_p1)  ;;  %v697_v42 = vld [vmem:[%s1726_s18 + $0x8] sm:$0xff] (!%p941_p1) }
  0x9b   : > { %1102 = vmatprep.subr.bf16.mxu1 %v1101_v57 }
  0x9c   : > { %v484_v61 = vadd.f32 %v482_v49, %v471_v55  ;;  %v485_v18 = vadd.f32 %v483_v14, %v472_v16 }
  0x9d   : > { %1076 = vmatpush3.bf16.msra.mxu0 %v1073_v39  ;;  %p680_p6 = scmp.eq.s32.totalorder %s418_s17, 1 }
  0x9e   : > { %1078 = vmatprep.subr.bf16.mxu0 %v1077_v53  ;;  %1019 = vmatprep.mubr.f32.mxu0 %v484_v61 }
  0x9f   : > { %1104 = vmatpush3.bf16.msra.mxu1 %v1101_v57  ;;  %s683_s26 = scalar_select %p680_p6, 1, 0 }
  0xa0   : > { %1106 = vmatprep.subr.bf16.mxu1 %v1105_v2 }
  0xa1   : > { %1080 = vmatpush3.bf16.msra.mxu0 %v1077_v53  ;;  %v684_v30 = vstv %s683_s26 }
  0xa2   : > { %1082 = vmatprep.subr.bf16.mxu0 %v1081_v0  ;;  %vm685_vm0 = vcmp.eq.s32.totalorder %v684_v30, 1 }
  0xa3   : > { %1108 = vmatpush3.bf16.msra.mxu1 %v1105_v2 }
  0xa4   : > { %1110 = vmatprep.subr.bf16.mxu1 %v1109_v10 }
  0xa5   : > { %1084 = vmatpush3.bf16.msra.mxu0 %v1081_v0 }
  0xa6   : > { %1086 = vmatprep.subr.bf16.mxu0 %v1085_v9 }
  0xa7   : > { %1112 = vmatpush3.bf16.msra.mxu1 %v1109_v10 }
  0xa8   : > { %1114 = vmatprep.subr.bf16.mxu1 %v1113_v17 }
  0xa9   : > { %1088 = vmatpush3.bf16.msra.mxu0 %v1085_v9 }
  0xab   : > { %1116 = vmatpush3.bf16.msra.mxu1 %v1113_v17 }
  0xac   : > { %1020 = vmatmul.mubr.f32.vlgmr.msra.gmra.mrb[0].mxu0 %v485_v18  ;;  %1118 = vmatprep.subr.bf16.mxu1 %v1117_v21 }
  0xaf   : > { %1120 = vmatpush3.bf16.msra.mxu1 %v1117_v21 }
 0x17f   : > { %v1021_v23 = vpop.f32.mrb[0].mxu0 }
 0x180   : > { %v579_v24 = vadd.f32 %v1021_v23, %v939_v22  ;;  %v573_v25 = vpop.f32.mrb[1].mxu0 }
 0x181   : > { %v574_v26 = vadd.f32 %v939_v22, %v573_v25 }
 0x182   : > { %v583_v28 = vmax.f32 %v579_v24, 0.0 }
 0x183   : > { %v582_v27 = vmax.f32 %v574_v26, 0.0 }
 0x185   : > { %1054 = vmatprep.mubr.f32.mxu1 %v582_v27 }
 0x186   : > { %1055 = vmatmul.mubr.f32.vlgmr.msra.gmra.mrb[0].mxu1 %v583_v28 }
 0x259   : > { %v1056_v31 = vpop.f32.mrb[0].mxu1 }
 0x25a   : > { %v677_v32 = vadd.f32 %v1056_v31, %v940_v29  ;;  %v671_v33 = vpop.f32.mrb[1].mxu1 }
 0x25b   : > { %v672_v34 = vadd.f32 %v940_v29, %v671_v33 }
 0x25c   : > { %v682_v35 = vadd.f32 %v677_v32, %v1747_v13  ;;  %695 = sbr.rel (%p941_p1) target bundleno = 613 (0x265), region = 56 }
 0x25d   : > { %v681_v36 = vadd.f32 %v672_v34, %v1750_v15 }
 0x25e   : > { %v687_v37 = vsel %vm685_vm0, %v682_v35, %v677_v32 }
 0x25f   : > { %v689_v38 = vmax.f32 %v687_v37, 0.0  ;;  %v686_v39 = vsel %vm685_vm0, %v681_v36, %v672_v34 }
 0x260   : > { %v688_v40 = vmax.f32 %v686_v39, 0.0 }
 0x261   : > { %691 = vst [vmem:[#allocation2 + $0x10] sm:$0xff] %v689_v38  ;;  %v699_v44 = vadd.f32 (!%p941_p1), %v697_v42, %v689_v38 }
 0x262   : > { %690 = vst [vmem:[#allocation2 + $0x8] sm:$0xff] %v688_v40  ;;  %v698_v43 = vadd.f32 (!%p941_p1), %v696_v41, %v688_v40 }
 0x263   : > { %701 = vst [vmem:[%s1726_s18 + $0x8] sm:$0xff] %v699_v44 }
 0x264   : > { %700 = vst [vmem:[%s1726_s18] sm:$0xff] %v698_v43 }
 0x265 PF: > { %s950_s13 = sshll.u32 %s1422_s12, 8  ;;  %s724_s4 = sshll.u32 %s1726_s18, 4  ;;  %s1824_s4 = int_to_ptr.vmem [resolvable:$true] %s724_s4 }
 0x266   : > { %s1821_s14 = scalar_lea.hbm %s1895_s6, %s950_s13  ;;  %s1941_s0 = sand.u32 1, %s1398_s29  }
 0x267   : > { %s1828_s9 = scalar_lea.sflag [#allocation7], %s1941_s0  ;;  %s1306_s20 = scalar_lea.vmem %s1824_s4, 256 }
 0x268   : > { %p1307_p2 = scmp.ne.s32.totalorder %s1824_s4, %s1306_s20  ;;  %p1942_p3 = scmp.ne.s32.totalorder %s1929_s28, 0 }
 0x269   : > { %s1442_s12 = smov [#allocation10]  }
 0x26a   : > { %p1308_p7 = pnand %p1307_p2, %p1942_p3  ;;  %s1310_s11 = sshll.u32 %s1442_s12, 4  ;;  %s1311_s11 = int_to_ptr.vmem [resolvable:$false] %s1310_s11 }
 0x26b   : > { %s1312_s3 = scalar_lea.vmem %s1311_s11, 512  ;;  %p1313_p5 = scmp.lt.s32.totalorder %s1824_s4, %s1311_s11 }
 0x26c   : > { %p1309_p4 = pneg %p1308_p7  ;;  %p1314_p10 = scmp.lt.s32.totalorder %s1312_s3, %s1306_s20 }
 0x26e   : > { %p1315_p12 = por %p1314_p10, %p1313_p5 }
 0x270   : > { %p1316_p8 = pnand %p1315_p12, %p1309_p4 }
 0x272   : > { %1319 = shalt.err (!%p1316_p8)
}
 0x273   : > { %s1320_s18 = scalar_lea.hbm %s1821_s14, 256  ;;  %s1324_s15 = scalar_lea.hbm %s1895_s6, 512 }
 0x274   : > { %p1321_p13 = scmp.ne.s32.totalorder %s1821_s14, %s1320_s18  ;;  %p1325_p0 = scmp.lt.u32.totalorder %s1821_s14, %s1895_s6 }
 0x275   : > { %p1326_p6 = scmp.lt.u32.totalorder %s1324_s15, %s1320_s18  ;;  %p1328_p2 = scmp.lt.u32.totalorder %s1320_s18, %s1821_s14 }
 0x276   : > { %p1322_p9 = pnand %p1321_p13, %p1942_p3 }
 0x277   : > { %p1327_p1 = por %p1326_p6, %p1325_p0 }
 0x278   : > { %p1323_p11 = pneg %p1322_p9 }
 0x279   : > { %p1329_p7 = por %p1328_p2, %p1327_p1 }
 0x27b   : > { %p1330_p4 = pnand %p1329_p7, %p1323_p11 }
 0x27d   : > { %1333 = shalt.err (!%p1330_p4)
}
 0x27e   : > { %s1443_s23 = smov 128   ;;  %s1444_s16 = smov 8  }
 0x27f   : > { %1125 = dma.vmem_to_hbm [thread:$0]  (%p1942_p3), %s1824_s4, 256, %s1821_s14, %s1828_s9, %s1443_s23, %s1443_s23, %s1444_s16  }
 0x280 PF: > { %s1943_s24 = sld [smem:[#allocation21_spill]]  ;;  %s1944_s19 = sld [smem:[#allocation15_spill]] }
 0x281   : > { %s1945_s10 = sld [smem:[#allocation26_spill]] }
 0x286   : > { %p1139_p5 = scmp.ge.s32.totalorder %s1943_s24, 2  ;;  %s742_s17 = sand.u32 1, %s1944_s19  }
 0x287   : > { %p1946_p10 = scmp.ne.s32.totalorder %s1945_s10, 0  ;;  %s743_s26 = scalar_lea.sflag [#allocation7], %s742_s17 }
 0x289   : > { %p1135_p12 = pnand %p1139_p5, %p1946_p10 }
 0x28b   : > { %1389 = dma.done.wait (!%p1135_p12), %s743_s26, 256  }
 0x28c   : > { %1391 = vsyncadd (!%p1135_p12), %s743_s26, 4294967040  ;;  %s33_s15 = sadd.s32 1, %s1943_s24   ;;  %s1947_s13 = sld [smem:[#allocation16_spill]] }
 0x28d   : > { %p30_p8 = scmp.ge.s32.totalorder %s33_s15, 12   ;;  %s1948_s30 = sld [smem:[#allocation25_spill]] }
 0x28e   : > { %s1949_s8 = sld [smem:[#allocation17_spill]]  ;;  %s1950_s9 = sld [smem:[#allocation18_spill]] }
 0x28f   : > { %s1951_s10 = sld [smem:[#allocation24_spill]]  ;;  %s1952_s11 = sld [smem:[#allocation19_spill]] }
 0x290   : > { %s1953_s12 = sld [smem:[#allocation20_spill]]  ;;  %s1954_s28 = sld [smem:[#allocation22_spill]] }
 0x291   : > { %s1955_s14 = sld [smem:[#allocation23_spill]]  ;;  %s1956_s0 = smov %s1398_s29 }
 0x292   : > { %s1957_s29 = smov %s1947_s13  ;;  %32 = sbr.rel (!%p30_p8) target bundleno = 27 (0x1b), region = 131 }
 0x296   : > { %s1958_s13 = smov %s1954_s28 }
 0x299   :  { %759 = vsyncpa [#allocation6], 1 }
 0x29a   :  { %761 = vsyncpa [#allocation6 + $0x1], 1 }
 0x29b   :  { %762 = vsyncpa [#allocation9], 1 }
 0x29c   :  { %764 = vsyncpa [#allocation9 + $0x1], 1 }
 0x29d   :  { %765 = vsyncpa [#allocation7], 1 }
 0x29e   :  { %767 = vsyncpa [#allocation7 + $0x1], 1 }

</bundles_post_ra>
